<compile_context>
chip_gen: v6e
topology: v6e:2x2x1
jax: 0.10.0
libtpu: 0.0.40
codegen_flags: <defaults>
</compile_context>

<pallas_src>
import functools

import jax
import jax.numpy as jnp
from jax.experimental import pallas as pl
from jax.experimental.pallas import tpu as pltpu


def _critic_kernel_mxu(state_ref, action_ref, w1s_ref, w1a_ref, b1_ref,
                       w2_ref, b2_ref, wqp_ref, bq_ref, out_ref):
    """v6e/v7x variant: bf16 VPU bias+ReLU, q head on the MXU (padded wq),
    lane-dense [tb, 128] output (column 0 holds Q)."""
    bf16 = jnp.bfloat16
    s = state_ref[...].astype(bf16)
    a = action_ref[...].astype(bf16)

    # fc1: split matmul summed into one f32 accumulator == matmul of concat.
    h1 = jnp.dot(s, w1s_ref[...], preferred_element_type=jnp.float32)
    h1 = h1 + jnp.dot(a, w1a_ref[...], preferred_element_type=jnp.float32)
    h1 = jnp.maximum(h1.astype(bf16) + b1_ref[...].astype(bf16), 0.0)  # bf16 VPU

    # fc2
    h2 = jnp.dot(h1, w2_ref[...], preferred_element_type=jnp.float32)
    h2 = jnp.maximum(h2.astype(bf16) + b2_ref[...].astype(bf16), 0.0)  # bf16 VPU

    # q head on the MXU: wqp is [f2, 128] with wq in column 0 -> lane-dense slab.
    q = jnp.dot(h2, wqp_ref[...], preferred_element_type=jnp.float32)
    out_ref[...] = (q + bq_ref[0, 0]).astype(out_ref.dtype)


def _critic_kernel_vpu(state_ref, action_ref, w1s_ref, w1a_ref, b1_ref,
                       w2_ref, b2_ref, wq_ref, bq_ref, out_ref):
    """v5e variant: f32 VPU bias/ReLU (no bf16 VPU), VPU multiply + lane
    reduction q head (MXU is the binding unit on v5e)."""
    s = state_ref[...].astype(jnp.bfloat16)
    a = action_ref[...].astype(jnp.bfloat16)

    h1 = jnp.dot(s, w1s_ref[...], preferred_element_type=jnp.float32)
    h1 = h1 + jnp.dot(a, w1a_ref[...], preferred_element_type=jnp.float32)
    h1 = jnp.maximum(h1 + b1_ref[...], 0.0)

    h2 = jnp.dot(h1.astype(jnp.bfloat16), w2_ref[...],
                 preferred_element_type=jnp.float32)
    h2 = jnp.maximum(h2 + b2_ref[...], 0.0)

    q = jnp.sum(h2 * wq_ref[...], axis=-1, keepdims=True) + bq_ref[0, 0]
    # TODO(synk): a lane-dense (grid, tb) transposed output would avoid the
    # masked vst.msk stores on this path too; kept (bp, 1) for robust lowering.
    out_ref[...] = q.astype(out_ref.dtype)


def _round_up(x, m):
    return ((x + m - 1) // m) * m


def _choose_batch_tile(B, tile_b):
    """Batch tile: as large as tile_b allows (amortize ~0.35us/step pipeline
    overhead), multiple of 256 for full-height MXU M-tiles (v6e/v7x 256-wide
    MXU), and >= 2 grid steps when the batch allows it (v7x dual-TC)."""
    b8 = _round_up(B, 8)
    tb = min(tile_b, b8)
    if B > 256:
        # Cap tb at round_up(B/2, 256) so grid >= 2 and the "parallel" batch
        # axis actually shards across both TensorCores on v7x.
        tb = min(tb, _round_up(pl.cdiv(b8, 2), 256))
    if tb >= 256:
        tb -= tb % 256
    tb = max(tb, 8)
    bp = _round_up(B, tb)
    return tb, bp


def _default_mxu_q_head():
    """True (bf16 VPU + MXU q head) on v6e/v7x; False (f32 VPU + lane-reduce
    q head) on v5e and older generations."""
    try:
        kind = jax.devices()[0].device_kind.lower()
    except Exception:
        return True
    for tag in ("v2", "v3", "v4", "v5"):
        if tag in kind:
            return False
    return True


@functools.partial(jax.jit, static_argnames=("tile_b", "mxu_q_head"))
def critic_forward(state, action, params, *, tile_b=1024, mxu_q_head=True):
    """Fused CriticNet forward: Q = q(relu(fc2(relu(fc1([state, action]))))).

    tile_b is worth sweeping in {256, 512, 1024} per generation."""
    w1s, w1a, b1 = params["w1s"], params["w1a"], params["b1"]
    w2, b2 = params["w2"], params["b2"]
    wq, bq = params["wq"], params["bq"]

    B, d_state = state.shape
    _, d_action = action.shape
    f1 = w1s.shape[1]
    f2 = w2.shape[1]

    tb, bp = _choose_batch_tile(B, tile_b)
    if bp != B:
        pad = ((0, bp - B), (0, 0))
        state = jnp.pad(state, pad)
        action = jnp.pad(action, pad)
    grid = (bp // tb,)

    def batch_spec(d):  # batch-tiled, auto-pipelined
        return pl.BlockSpec((tb, d), lambda i: (i, 0))

    def resident(shape):  # constant index_map -> VMEM-resident across steps
        return pl.BlockSpec(shape, lambda i: (0, 0))

    if mxu_q_head:
        kernel = _critic_kernel_mxu
        # Pad the q-head row vector into [f2, 128] bf16 (wq in column 0): the
        # q head runs on the MXU and the output block is a lane-dense
        # [tb, 128] slab (unmasked vst); column 0 is sliced off below.
        wq_arg = jnp.pad(wq.astype(jnp.bfloat16).T, ((0, 0), (0, 127)))
        wq_spec = resident((f2, 128))
        out_cols = 128
    else:
        kernel = _critic_kernel_vpu
        wq_arg = wq
        wq_spec = resident((1, f2))
        out_cols = 1

    flops = 2 * bp * ((d_state + d_action) * f1 + f1 * f2 + f2 * out_cols)
    bytes_accessed = (
        4 * bp * (d_state + d_action)                    # activations in (f32)
        + 2 * ((d_state + d_action) * f1 + f1 * f2)      # bf16 weights (once)
        + 4 * (f1 + f2 + 1)                              # f32 biases + bq
        + wq_arg.size * wq_arg.dtype.itemsize            # q-head weights
        + 4 * bp * out_cols)                             # output (f32)

    out = pl.pallas_call(
        kernel,
        out_shape=jax.ShapeDtypeStruct((bp, out_cols), jnp.float32),
        grid=grid,
        in_specs=[
            batch_spec(d_state),                                # state  [tb, Din]
            batch_spec(d_action),                               # action [tb, Na]
            resident((d_state, f1)),                            # w1s
            resident((d_action, f1)),                           # w1a
            resident((1, f1)),                                  # b1
            resident((f1, f2)),                                 # w2
            resident((1, f2)),                                  # b2
            wq_spec,                                            # wq (padded or row)
            pl.BlockSpec(memory_space=pltpu.MemorySpace.SMEM),  # bq scalar
        ],
        out_specs=pl.BlockSpec((tb, out_cols), lambda i: (i, 0)),
        compiler_params=pltpu.CompilerParams(
            dimension_semantics=("parallel",)),
        cost_estimate=pl.CostEstimate(
            flops=int(flops), transcendentals=0,
            bytes_accessed=int(bytes_accessed)),
    )(state, action, w1s, w1a, b1, w2, b2, wq_arg, bq)

    return out[:B, :1]


def init_params(key, input_dim, n_actions, fc1_dims=256, fc2_dims=256):
    """Deterministic synthetic params matching nn.Linear's U(-1/sqrt(fan_in), .)
    init. Weights stored [in, out] (transposed vs torch); fc1 split into
    state/action halves; MXU weights bf16, biases and the q head f32."""
    k1, k2, k3, k4, k5, k6 = jax.random.split(key, 6)
    d_in = input_dim + n_actions

    def u(k, shape, fan_in):
        lim = 1.0 / jnp.sqrt(fan_in)
        return jax.random.uniform(k, shape, jnp.float32, -lim, lim)

    w1 = u(k1, (d_in, fc1_dims), d_in)
    return {
        "w1s": w1[:input_dim].astype(jnp.bfloat16),
        "w1a": w1[input_dim:].astype(jnp.bfloat16),
        "b1": u(k2, (1, fc1_dims), d_in),
        "w2": u(k3, (fc1_dims, fc2_dims), fc1_dims).astype(jnp.bfloat16),
        "b2": u(k4, (1, fc2_dims), fc1_dims),
        "wq": u(k5, (1, fc2_dims), fc2_dims),   # row vector, f32
        "bq": u(k6, (1, 1), fc2_dims),
    }


def _reference_forward(state, action, params, *, mxu_q_head=True):
    """Pure-JAX reference mirroring the kernel numerics for the chosen path."""
    f32, bf16 = jnp.float32, jnp.bfloat16
    h1 = (jnp.dot(state.astype(bf16), params["w1s"], preferred_element_type=f32)
          + jnp.dot(action.astype(bf16), params["w1a"], preferred_element_type=f32))
    if mxu_q_head:
        h1 = jnp.maximum(h1.astype(bf16) + params["b1"].astype(bf16), 0.0)
        h2 = jnp.dot(h1, params["w2"], preferred_element_type=f32)
        h2 = jnp.maximum(h2.astype(bf16) + params["b2"].astype(bf16), 0.0)
        q = jnp.dot(h2, params["wq"].astype(bf16).T, preferred_element_type=f32)
        return q + params["bq"]
    h1 = jnp.maximum(h1 + params["b1"], 0.0)
    h2 = jnp.dot(h1.astype(bf16), params["w2"],
                 preferred_element_type=f32) + params["b2"]
    h2 = jnp.maximum(h2, 0.0)
    return jnp.sum(h2 * params["wq"], axis=-1, keepdims=True) + params["bq"]


if __name__ == "__main__":
    key = jax.random.PRNGKey(0)
    k_p, k_s, k_a = jax.random.split(key, 3)

    input_dim = 16      # input_dims = [16]
    n_actions = 4
    params = init_params(k_p, input_dim, n_actions)
    mxu = _default_mxu_q_head()

    # Small batch: single 8-row tile, no padding.
    batch = 8
    state = jax.random.normal(k_s, (batch, input_dim), jnp.float32)
    action = jax.random.normal(k_a, (batch, n_actions), jnp.float32)
    q = jax.block_until_ready(critic_forward(state, action, params, mxu_q_head=mxu))
    q_ref = _reference_forward(state, action, params, mxu_q_head=mxu)
    assert q.shape == (batch, 1)
    assert jnp.allclose(q, q_ref, atol=2e-3, rtol=2e-3), "mismatch (batch=8)"

    # Larger batch: 256-row tiles, 2 grid steps (dual-TC on v7x), padded rows.
    batch2 = 300
    k_s2, k_a2 = jax.random.split(jax.random.PRNGKey(1))
    state2 = jax.random.normal(k_s2, (batch2, input_dim), jnp.float32)
    action2 = jax.random.normal(k_a2, (batch2, n_actions), jnp.float32)
    q2 = jax.block_until_ready(critic_forward(state2, action2, params, mxu_q_head=mxu))
    q2_ref = _reference_forward(state2, action2, params, mxu_q_head=mxu)
    assert q2.shape == (batch2, 1)
    assert jnp.allclose(q2, q2_ref, atol=2e-3, rtol=2e-3), "mismatch (batch=300)"

    # Exercise the alternate kernel variant too (both must lower and agree).
    q3 = jax.block_until_ready(
        critic_forward(state, action, params, mxu_q_head=not mxu))
    q3_ref = _reference_forward(state, action, params, mxu_q_head=not mxu)
    assert q3.shape == (batch, 1)
    assert jnp.allclose(q3, q3_ref, atol=2e-3, rtol=2e-3), "mismatch (alt path)"

    print("KERNEL_OK")
</pallas_src>

<mosaic_0001>
module attributes {stable_mosaic.version = 11 : i64} {
  func.func @_critic_kernel_mxu(%arg0: i32, %arg1: memref<8x16xf32, #tpu.memory_space<vmem>>, %arg2: memref<8x4xf32, #tpu.memory_space<vmem>>, %arg3: memref<16x256xbf16, #tpu.memory_space<vmem>>, %arg4: memref<4x256xbf16, #tpu.memory_space<vmem>>, %arg5: memref<1x256xf32, #tpu.memory_space<vmem>>, %arg6: memref<256x256xbf16, #tpu.memory_space<vmem>>, %arg7: memref<1x256xf32, #tpu.memory_space<vmem>>, %arg8: memref<256x128xbf16, #tpu.memory_space<vmem>>, %arg9: memref<1x1xf32, #tpu.memory_space<smem>>, %arg10: memref<8x128xf32, #tpu.memory_space<vmem>>) attributes {dimension_semantics = [#tpu.dimension_semantics<parallel>], iteration_bounds = array<i64: 1>, scalar_prefetch = 0 : i64, scratch_operands = 0 : i64, tpu.core_type = #tpu.core_type<tc>, window_params = [{transform_indices = @transform_0, window_bounds = array<i64: 8, 16>}, {transform_indices = @transform_1, window_bounds = array<i64: 8, 4>}, {pipeline_mode = #tpu.pipeline_mode<synchronous>, transform_indices = @transform_2, window_bounds = array<i64: 16, 256>}, {pipeline_mode = #tpu.pipeline_mode<synchronous>, transform_indices = @transform_3, window_bounds = array<i64: 4, 256>}, {pipeline_mode = #tpu.pipeline_mode<synchronous>, transform_indices = @transform_4, window_bounds = array<i64: 1, 256>}, {pipeline_mode = #tpu.pipeline_mode<synchronous>, transform_indices = @transform_5, window_bounds = array<i64: 256, 256>}, {pipeline_mode = #tpu.pipeline_mode<synchronous>, transform_indices = @transform_6, window_bounds = array<i64: 1, 256>}, {pipeline_mode = #tpu.pipeline_mode<synchronous>, transform_indices = @transform_7, window_bounds = array<i64: 256, 128>}, {transform_indices = @transform_8, window_bounds = array<i64: 1, 1>}, {transform_indices = @transform_9, window_bounds = array<i64: 8, 128>}]} {
    %c0 = arith.constant 0 : index
    %c0_0 = arith.constant 0 : index
    %0 = vector.load %arg1[%c0, %c0_0] : memref<8x16xf32, #tpu.memory_space<vmem>>, vector<8x16xf32>
    %1 = arith.truncf %0 : vector<8x16xf32> to vector<8x16xbf16>
    %c0_1 = arith.constant 0 : index
    %c0_2 = arith.constant 0 : index
    %2 = vector.load %arg2[%c0_1, %c0_2] : memref<8x4xf32, #tpu.memory_space<vmem>>, vector<8x4xf32>
    %3 = arith.truncf %2 : vector<8x4xf32> to vector<8x4xbf16>
    %c0_3 = arith.constant 0 : index
    %c0_4 = arith.constant 0 : index
    %4 = vector.load %arg3[%c0_3, %c0_4] : memref<16x256xbf16, #tpu.memory_space<vmem>>, vector<16x256xbf16>
    %cst = arith.constant dense<0.000000e+00> : vector<8x256xf32>
    %5 = tpu.matmul %1, %4, %cst {dimension_numbers = #tpu.dot_dimension_numbers<[1], [0], [0], [1], [0, 0, 1, 1], [], []>} : vector<8x16xbf16>, vector<16x256xbf16>, vector<8x256xf32> -> vector<8x256xf32>
    %c0_5 = arith.constant 0 : index
    %c0_6 = arith.constant 0 : index
    %6 = vector.load %arg4[%c0_5, %c0_6] : memref<4x256xbf16, #tpu.memory_space<vmem>>, vector<4x256xbf16>
    %cst_7 = arith.constant dense<0.000000e+00> : vector<8x256xf32>
    %7 = tpu.matmul %3, %6, %cst_7 {dimension_numbers = #tpu.dot_dimension_numbers<[1], [0], [0], [1], [0, 0, 1, 1], [], []>} : vector<8x4xbf16>, vector<4x256xbf16>, vector<8x256xf32> -> vector<8x256xf32>
    %8 = arith.addf %5, %7 : vector<8x256xf32>
    %9 = arith.truncf %8 : vector<8x256xf32> to vector<8x256xbf16>
    %c0_8 = arith.constant 0 : index
    %c0_9 = arith.constant 0 : index
    %10 = vector.load %arg5[%c0_8, %c0_9] : memref<1x256xf32, #tpu.memory_space<vmem>>, vector<1x256xf32>
    %11 = arith.truncf %10 : vector<1x256xf32> to vector<1x256xbf16>
    %12 = vector.broadcast %11 : vector<1x256xbf16> to vector<8x256xbf16>
    %13 = arith.addf %9, %12 : vector<8x256xbf16>
    %cst_10 = arith.constant 0.000000e+00 : bf16
    %14 = vector.broadcast %cst_10 : bf16 to vector<8x256xbf16>
    %15 = arith.maximumf %13, %14 : vector<8x256xbf16>
    %c0_11 = arith.constant 0 : index
    %c0_12 = arith.constant 0 : index
    %16 = vector.load %arg6[%c0_11, %c0_12] : memref<256x256xbf16, #tpu.memory_space<vmem>>, vector<256x256xbf16>
    %cst_13 = arith.constant dense<0.000000e+00> : vector<8x256xf32>
    %17 = tpu.matmul %15, %16, %cst_13 {dimension_numbers = #tpu.dot_dimension_numbers<[1], [0], [0], [1], [0, 0, 1, 1], [], []>} : vector<8x256xbf16>, vector<256x256xbf16>, vector<8x256xf32> -> vector<8x256xf32>
    %18 = arith.truncf %17 : vector<8x256xf32> to vector<8x256xbf16>
    %c0_14 = arith.constant 0 : index
    %c0_15 = arith.constant 0 : index
    %19 = vector.load %arg7[%c0_14, %c0_15] : memref<1x256xf32, #tpu.memory_space<vmem>>, vector<1x256xf32>
    %20 = arith.truncf %19 : vector<1x256xf32> to vector<1x256xbf16>
    %21 = vector.broadcast %20 : vector<1x256xbf16> to vector<8x256xbf16>
    %22 = arith.addf %18, %21 : vector<8x256xbf16>
    %cst_16 = arith.constant 0.000000e+00 : bf16
    %23 = vector.broadcast %cst_16 : bf16 to vector<8x256xbf16>
    %24 = arith.maximumf %22, %23 : vector<8x256xbf16>
    %c0_17 = arith.constant 0 : index
    %c0_18 = arith.constant 0 : index
    %25 = vector.load %arg8[%c0_17, %c0_18] : memref<256x128xbf16, #tpu.memory_space<vmem>>, vector<256x128xbf16>
    %cst_19 = arith.constant dense<0.000000e+00> : vector<8x128xf32>
    %26 = tpu.matmul %24, %25, %cst_19 {dimension_numbers = #tpu.dot_dimension_numbers<[1], [0], [0], [1], [0, 0, 1, 1], [], []>} : vector<8x256xbf16>, vector<256x128xbf16>, vector<8x128xf32> -> vector<8x128xf32>
    %c0_20 = arith.constant 0 : index
    %c0_21 = arith.constant 0 : index
    %27 = memref.load %arg9[%c0_20, %c0_21] : memref<1x1xf32, #tpu.memory_space<smem>>
    %28 = vector.broadcast %27 : f32 to vector<8x128xf32>
    %29 = arith.addf %26, %28 : vector<8x128xf32>
    %c0_22 = arith.constant 0 : index
    %c0_23 = arith.constant 0 : index
    %30 = vector.load %arg10[%c0_22, %c0_23] : memref<8x128xf32, #tpu.memory_space<vmem>>, vector<8x128xf32>
    tpu.vector_store %arg10[%c0_22, %c0_23], %29 {strides = array<i32>} : memref<8x128xf32, #tpu.memory_space<vmem>>, vector<8x128xf32>,
    return
  }
  func.func @transform_0(%arg0: i32) -> (i32, i32) {
    %c0_i32 = arith.constant 0 : i32
    %c0_i32_0 = arith.constant 0 : i32
    return %arg0, %c0_i32 : i32, i32
  }
  func.func @transform_1(%arg0: i32) -> (i32, i32) {
    %c0_i32 = arith.constant 0 : i32
    %c0_i32_0 = arith.constant 0 : i32
    return %arg0, %c0_i32 : i32, i32
  }
  func.func @transform_2(%arg0: i32) -> (i32, i32) {
    %c0_i32 = arith.constant 0 : i32
    %c0_i32_0 = arith.constant 0 : i32
    %c0_i32_1 = arith.constant 0 : i32
    return %c0_i32, %c0_i32_0 : i32, i32
  }
  func.func @transform_3(%arg0: i32) -> (i32, i32) {
    %c0_i32 = arith.constant 0 : i32
    %c0_i32_0 = arith.constant 0 : i32
    %c0_i32_1 = arith.constant 0 : i32
    return %c0_i32, %c0_i32_0 : i32, i32
  }
  func.func @transform_4(%arg0: i32) -> (i32, i32) {
    %c0_i32 = arith.constant 0 : i32
    %c0_i32_0 = arith.constant 0 : i32
    %c0_i32_1 = arith.constant 0 : i32
    return %c0_i32, %c0_i32_0 : i32, i32
  }
  func.func @transform_5(%arg0: i32) -> (i32, i32) {
    %c0_i32 = arith.constant 0 : i32
    %c0_i32_0 = arith.constant 0 : i32
    %c0_i32_1 = arith.constant 0 : i32
    return %c0_i32, %c0_i32_0 : i32, i32
  }
  func.func @transform_6(%arg0: i32) -> (i32, i32) {
    %c0_i32 = arith.constant 0 : i32
    %c0_i32_0 = arith.constant 0 : i32
    %c0_i32_1 = arith.constant 0 : i32
    return %c0_i32, %c0_i32_0 : i32, i32
  }
  func.func @transform_7(%arg0: i32) -> (i32, i32) {
    %c0_i32 = arith.constant 0 : i32
    %c0_i32_0 = arith.constant 0 : i32
    %c0_i32_1 = arith.constant 0 : i32
    return %c0_i32, %c0_i32_0 : i32, i32
  }
  func.func @transform_8(%arg0: i32) -> (i32, i32) {
    %c0_i32 = arith.constant 0 : i32
    %c0_i32_0 = arith.constant 0 : i32
    %c0_i32_1 = arith.constant 0 : i32
    return %c0_i32, %c0_i32_0 : i32, i32
  }
  func.func @transform_9(%arg0: i32) -> (i32, i32) {
    %c0_i32 = arith.constant 0 : i32
    %c0_i32_0 = arith.constant 0 : i32
    return %arg0, %c0_i32 : i32, i32
  }
}

</mosaic_0001>

<bundles_post_ra>
// kernel: critic_forward.1
= control target key start
LH: loop header
LB: loop body
LE: loop exit
PB: predicated region body
PF: predicated region fallthrough
CT: control target
= control target key end

     0   :  { %vm54_vm0 = vcmask 1041408   ;;  %v777_v1 = vmov 0   ;;  %vm50_vm1 = vcmask 31744   ;;  %vm112_vm2 = vcmask 130048   ;;  %s1005_s3 = inlined_call_operand.vmem [shape: bf16[4,256], index: 3, kind: input, shape index: {}]   ;;  %s1006_s1 = inlined_call_operand.vmem [shape: f32[8,4], index: 1, kind: input, shape index: {}]   ;;  %s1007_s2 = inlined_call_operand.vmem [shape: bf16[16,256], index: 2, kind: input, shape index: {}]   ;;  %s1008_s5 = inlined_call_operand.vmem [shape: bf16[256,256], index: 5, kind: input, shape index: {}]   ;;  %s1009_s0 = inlined_call_operand.vmem [shape: f32[8,16], index: 0, kind: input, shape index: {}]   ;;  %s1010_s7 = inlined_call_operand.vmem [shape: bf16[256,128], index: 7, kind: input, shape index: {}]   ;;  %s1011_s4 = inlined_call_operand.vmem [shape: f32[1,256], index: 4, kind: input, shape index: {}]   ;;  %s1012_s6 = inlined_call_operand.vmem [shape: f32[1,256], index: 6, kind: input, shape index: {}]   ;;  %s1013_s8 = inlined_call_operand.<no memory space> [shape: f32[1,1], index: 8, kind: input, shape index: {}]   ;;  %s1014_s9 = inlined_call_operand.vmem [shape: f32[8,128], index: 9, kind: output, shape index: {}]  }
   0x1   :  { %v633_v0 = vld.sshfl [vmem:[%s1005_s3] sm:$0x33 pattern:$0x76325410]  ;;  %93 = vmatprep.mubr.bf16.mxu1 %v777_v1  ;;  %v712_v5 = vld [vmem:[%s1007_s2 + $0x4] ss:$8 sps:$4 sm:$0xff]   ;;  %v161_v54 = vlaneseq }
   0x2   :  { %v36_v2 = vld [vmem:[%s1006_s1] sm:$0xff]  ;;  %v49_v3 = vcombine.high %v633_v0, %v633_v0  ;;  %v56_v4 = vsel %vm54_vm0, %v633_v0, 0  ;;  %v713_v7 = vld [vmem:[%s1008_s5 + $0x74] ss:$8 sps:$4 sm:$0xff]   ;;  %v715_v8 = vld [vmem:[%s1008_s5 + $0x70] ss:$8 sps:$4 sm:$0xff]  }
   0x3   :  { %v37_v6 = vpack.c.bf16 %v36_v2, %v36_v2  ;;  %v710_v9 = vld [vmem:[%s1007_s2] ss:$8 sps:$4 sm:$0xff]   ;;  %v716_v10 = vld [vmem:[%s1008_s5 + $0x64] ss:$8 sps:$4 sm:$0xff]   ;;  %383 = vmatprep.subr.bf16.mxu0 %v713_v7  ;;  %v719_v12 = vld [vmem:[%s1008_s5 + $0x54] ss:$8 sps:$4 sm:$0xff]  }
   0x4   :  { %634 = vmatprep.subr.msk.bf16.mxu1 %vm54_vm0, %v49_v3  ;;  %384 = vmatpush1.bf16.msra.mxu0 %v715_v8  ;;  %v718_v11 = vld [vmem:[%s1008_s5 + $0x60] ss:$8 sps:$4 sm:$0xff]   ;;  %v721_v14 = vld [vmem:[%s1008_s5 + $0x50] ss:$8 sps:$4 sm:$0xff]   ;;  %v722_v16 = vld [vmem:[%s1008_s5 + $0x44] ss:$8 sps:$4 sm:$0xff]  }
   0x5   :  { %76 = vmatpush1.bf16.msra.mxu1 %v56_v4  ;;  %385 = vmatprep.subr.bf16.mxu0 %v716_v10  ;;  %v34_v13 = vld [vmem:[%s1009_s0] sm:$0xff]  ;;  %v725_v18 = vld [vmem:[%s1008_s5 + $0x34] ss:$8 sps:$4 sm:$0xff]   ;;  %v727_v19 = vld [vmem:[%s1008_s5 + $0x30] ss:$8 sps:$4 sm:$0xff]   ;;  %v162_v55 = vshrl.u32 %v161_v54, 7 }
   0x6   :  { %130 = vmatprep.subr.bf16.mxu1 %v712_v5  ;;  %v35_v15 = vpack.c.bf16 %v34_v13, %v34_v13  ;;  %v724_v17 = vld [vmem:[%s1008_s5 + $0x40] ss:$8 sps:$4 sm:$0xff]   ;;  %v728_v20 = vld [vmem:[%s1008_s5 + $0x24] ss:$8 sps:$4 sm:$0xff]   ;;  %v731_v22 = vld [vmem:[%s1008_s5 + $0x14] ss:$8 sps:$4 sm:$0xff]  }
   0x7   :  { %v730_v21 = vld [vmem:[%s1008_s5 + $0x20] ss:$8 sps:$4 sm:$0xff]   ;;  %v733_v23 = vld [vmem:[%s1008_s5 + $0x10] ss:$8 sps:$4 sm:$0xff]   ;;  %v734_v24 = vld [vmem:[%s1008_s5 + $0x4] ss:$8 sps:$4 sm:$0xff]  }
   0x8   :  { %635 = vmatmul.mubr.msk.bf16.vlgmr.msra.gmra.mxu1 %vm50_vm1, %v37_v6  ;;  %386 = vmatpush1.bf16.msra.mxu0 %v718_v11  ;;  %v736_v25 = vld [vmem:[%s1008_s5] ss:$8 sps:$4 sm:$0xff]   ;;  %v737_v26 = vld [vmem:[%s1008_s5 + $0xf4] ss:$8 sps:$4 sm:$0xff]   ;;  %v739_v27 = vld [vmem:[%s1008_s5 + $0xf0] ss:$8 sps:$4 sm:$0xff]  }
   0x9   :  { %131 = vmatpush1.bf16.msra.mxu1 %v710_v9  ;;  %148 = vmatprep.mubr.bf16.mxu1 %v777_v1  ;;  %v740_v28 = vld [vmem:[%s1008_s5 + $0xe4] ss:$8 sps:$4 sm:$0xff]   ;;  %v742_v29 = vld [vmem:[%s1008_s5 + $0xe0] ss:$8 sps:$4 sm:$0xff]   ;;  %v743_v30 = vld [vmem:[%s1008_s5 + $0xd4] ss:$8 sps:$4 sm:$0xff]  }
   0xa   :  { %387 = vmatprep.subr.bf16.mxu0 %v719_v12  ;;  %v745_v31 = vld [vmem:[%s1008_s5 + $0xd0] ss:$8 sps:$4 sm:$0xff]   ;;  %v746_v32 = vld [vmem:[%s1008_s5 + $0xc4] ss:$8 sps:$4 sm:$0xff]   ;;  %v748_v33 = vld [vmem:[%s1008_s5 + $0xc0] ss:$8 sps:$4 sm:$0xff]  }
   0xb   :  { %v749_v34 = vld [vmem:[%s1008_s5 + $0xb4] ss:$8 sps:$4 sm:$0xff]   ;;  %v751_v35 = vld [vmem:[%s1008_s5 + $0xb0] ss:$8 sps:$4 sm:$0xff]   ;;  %v752_v36 = vld [vmem:[%s1008_s5 + $0xa4] ss:$8 sps:$4 sm:$0xff]  }
   0xc   :  { %388 = vmatpush1.bf16.msra.mxu0 %v721_v14  ;;  %v754_v37 = vld [vmem:[%s1008_s5 + $0xa0] ss:$8 sps:$4 sm:$0xff]   ;;  %v755_v38 = vld [vmem:[%s1008_s5 + $0x94] ss:$8 sps:$4 sm:$0xff]   ;;  %v757_v39 = vld [vmem:[%s1008_s5 + $0x90] ss:$8 sps:$4 sm:$0xff]  }
   0xd   :  { %389 = vmatprep.subr.bf16.mxu0 %v722_v16  ;;  %v758_v40 = vld [vmem:[%s1008_s5 + $0x84] ss:$8 sps:$4 sm:$0xff]   ;;  %v760_v41 = vld [vmem:[%s1008_s5 + $0x80] ss:$8 sps:$4 sm:$0xff]   ;;  %v761_v42 = vld [vmem:[%s1010_s7 + $0x78] sm:$0xff]   ;;  %v163_v56 = vsub.s32 0, %v162_v55 }
   0xe   :  { %v762_v43 = vld [vmem:[%s1010_s7 + $0x38] sm:$0xff]   ;;  %687 = vmatprep.subr.bf16.mxu1 %v761_v42  ;;  %v763_v44 = vld [vmem:[%s1010_s7 + $0x70] sm:$0xff]   ;;  %v765_v46 = vld [vmem:[%s1010_s7 + $0x68] sm:$0xff]   ;;  %v167_v58 = vsub.s32 1, %v162_v55 }
   0xf   :  { %v764_v45 = vld [vmem:[%s1010_s7 + $0x30] sm:$0xff]   ;;  %v766_v47 = vld [vmem:[%s1010_s7 + $0x28] sm:$0xff]   ;;  %v767_v48 = vld [vmem:[%s1010_s7 + $0x60] sm:$0xff]  }
  0x10   :  { %638 = vmatmul.mubr.msk.bf16.vlgmr.msra.gmra.mxu1 %vm112_vm2, %v35_v15  ;;  %390 = vmatpush1.bf16.msra.mxu0 %v724_v17  ;;  %v768_v49 = vld [vmem:[%s1010_s7 + $0x20] sm:$0xff]   ;;  %v769_v50 = vld [vmem:[%s1010_s7 + $0x58] sm:$0xff]   ;;  %v771_v52 = vld [vmem:[%s1010_s7 + $0x50] sm:$0xff]  }
  0x11   :  { %391 = vmatprep.subr.bf16.mxu0 %v725_v18  ;;  %688 = vmatpush3.bf16.msra.mxu1 %v762_v43  ;;  %v770_v51 = vld [vmem:[%s1010_s7 + $0x18] sm:$0xff]   ;;  %v772_v53 = vld [vmem:[%s1010_s7 + $0x10] sm:$0xff]   ;;  %v159_v57 = vld [vmem:[%s1011_s4] sm:$0x3] }
  0x12   :  { %689 = vmatprep.subr.bf16.mxu1 %v763_v44  ;;  %v164_v59 = vrot.slane %v159_v57, %v163_v56  ;;  %v168_v60 = vrot.slane %v159_v57, %v167_v58  ;;  %v491_v44 = vstv %s1013_s8 }
  0x14   :  { %392 = vmatpush1.bf16.msra.mxu0 %v727_v19  ;;  %v171_v63 = vpack.c.bf16 %v164_v59, %v164_v59  ;;  %v172_v0 = vpack.c.bf16 %v168_v60, %v168_v60 }
  0x15   :  { %393 = vmatprep.subr.bf16.mxu0 %v728_v20  ;;  %690 = vmatpush3.bf16.msra.mxu1 %v764_v45  ;;  %v773_v20 = vld [vmem:[%s1010_s7 + $0x48] sm:$0xff]  }
  0x16   :  { %691 = vmatprep.subr.bf16.mxu1 %v765_v46  ;;  %v174_v4 = vpack.i.b16 %v171_v63, %v171_v63  ;;  %v181_v5 = vpack.i.b16 %v172_v0, %v172_v0 }
  0x18   :  { %394 = vmatpush1.bf16.msra.mxu0 %v730_v21  ;;  %v179_v8 = vrot.slane %v174_v4, %v163_v56  ;;  %v186_v12 = vrot.slane %v181_v5, %v163_v56  ;;  %v774_v21 = vld [vmem:[%s1010_s7 + $0x8] sm:$0xff]  }
  0x19   :  { %395 = vmatprep.subr.bf16.mxu0 %v731_v22  ;;  %692 = vmatpush3.bf16.msra.mxu1 %v766_v47  ;;  %v775_v22 = vld [vmem:[%s1010_s7 + $0x40] sm:$0xff]  }
  0x1a   :  { %693 = vmatprep.subr.bf16.mxu1 %v767_v48 }
  0x1c   :  { %396 = vmatpush1.bf16.msra.mxu0 %v733_v23  ;;  %v776_v23 = vld [vmem:[%s1010_s7] sm:$0xff]  }
  0x1d   :  { %397 = vmatprep.subr.bf16.mxu0 %v734_v24  ;;  %694 = vmatpush3.bf16.msra.mxu1 %v768_v49  ;;  %v426_v24 = vld [vmem:[%s1012_s6] sm:$0x3] }
  0x1e   :  { %695 = vmatprep.subr.bf16.mxu1 %v769_v50 }
  0x20   :  { %398 = vmatpush1.bf16.msra.mxu0 %v736_v25  ;;  %v431_v25 = vrot.slane %v426_v24, %v163_v56 }
  0x21   :  { %399 = vmatprep.subr.bf16.mxu0 %v737_v26  ;;  %696 = vmatpush3.bf16.msra.mxu1 %v770_v51  ;;  %v435_v26 = vrot.slane %v426_v24, %v167_v58 }
  0x22   :  { %697 = vmatprep.subr.bf16.mxu1 %v771_v52 }
  0x24   :  { %400 = vmatpush2.bf16.msra.mxu0 %v739_v27  ;;  %v438_v27 = vpack.c.bf16 %v431_v25, %v431_v25 }
  0x25   :  { %401 = vmatprep.subr.bf16.mxu0 %v740_v28  ;;  %698 = vmatpush3.bf16.msra.mxu1 %v772_v53  ;;  %v439_v28 = vpack.c.bf16 %v435_v26, %v435_v26 }
  0x26   :  { %699 = vmatprep.subr.bf16.mxu1 %v773_v20 }
  0x28   :  { %402 = vmatpush2.bf16.msra.mxu0 %v742_v29  ;;  %v441_v29 = vpack.i.b16 %v438_v27, %v438_v27 }
  0x29   :  { %403 = vmatprep.subr.bf16.mxu0 %v743_v30  ;;  %700 = vmatpush3.bf16.msra.mxu1 %v774_v21  ;;  %v448_v30 = vpack.i.b16 %v439_v28, %v439_v28 }
  0x2a   :  { %701 = vmatprep.subr.bf16.mxu1 %v775_v22 }
  0x2c   :  { %404 = vmatpush2.bf16.msra.mxu0 %v745_v31 }
  0x2d   :  { %405 = vmatprep.subr.bf16.mxu0 %v746_v32  ;;  %702 = vmatpush3.bf16.msra.mxu1 %v776_v23  ;;  %v446_v32 = vrot.slane %v441_v29, %v163_v56 }
  0x30   :  { %406 = vmatpush2.bf16.msra.mxu0 %v748_v33 }
  0x31   :  { %407 = vmatprep.subr.bf16.mxu0 %v749_v34  ;;  %v453_v34 = vrot.slane %v448_v30, %v163_v56 }
  0x34   :  { %408 = vmatpush2.bf16.msra.mxu0 %v751_v35 }
  0x35   :  { %409 = vmatprep.subr.bf16.mxu0 %v752_v36 }
  0x38   :  { %410 = vmatpush2.bf16.msra.mxu0 %v754_v37 }
  0x39   :  { %411 = vmatprep.subr.bf16.mxu0 %v755_v38 }
  0x3c   :  { %412 = vmatpush2.bf16.msra.mxu0 %v757_v39 }
  0x3d   :  { %413 = vmatprep.subr.bf16.mxu0 %v758_v40 }
  0x40   :  { %414 = vmatpush2.bf16.msra.mxu0 %v760_v41 }
  0xc8   :  { %v95_v61 = vpop.f32.mrf.mxu1 }
  0xca   :  { %v97_v62 = vpop.f32.mrf.mxu1 }
  0xcc   :  { %v99_v2 = vpop.f32.mrf.mxu1 }
  0xce   :  { %v100_v3 = vpop.f32.mrf.mxu1 }
  0xd0   :  { %v150_v6 = vpop.f32.mrf.mxu1 }
  0xd1   :  { %v151_v7 = vadd.f32 %v150_v6, %v95_v61 }
  0xd2   :  { %v152_v9 = vpop.f32.mrf.mxu1 }
  0xd3   :  { %v157_v10 = vpack.c.bf16 %v151_v7, %v151_v7  ;;  %v153_v11 = vadd.f32 %v152_v9, %v97_v62 }
  0xd4   :  { %v154_v13 = vpop.f32.mrf.mxu1 }
  0xd5   :  { %v158_v14 = vpack.c.bf16 %v153_v11, %v153_v11  ;;  %v187_v15 = vadd.bf16 %v179_v8, %v157_v10 }
  0xd6   :  { %v155_v16 = vpop.f32.mrf.mxu1 }
  0xd7   :  { %v188_v17 = vadd.bf16 %v186_v12, %v158_v14  ;;  %v189_v19 = vmax.bf16 %v777_v1, %v187_v15 }
  0xd9   :  { %v190_v18 = vmax.bf16 %v777_v1, %v188_v17 }
  0xdb   :  { %415 = vmatprep.mubr.bf16.mxu0 %v190_v18 }
  0xdc   :  { %416 = vmatmul.mubr.bf16.vlgmr.msra.gmra.mxu0 %v189_v19 }
 0x19c   :  { %v417_v31 = vpop.f32.mrf.mxu0 }
 0x19d   :  { %v424_v33 = vpack.c.bf16 %v417_v31, %v417_v31 }
 0x19e   :  { %v419_v35 = vpop.f32.mrf.mxu0 }
 0x19f   :  { %v425_v36 = vpack.c.bf16 %v419_v35, %v419_v35  ;;  %v454_v37 = vadd.bf16 %v446_v32, %v424_v33 }
 0x1a0   :  { %v421_v38 = vpop.f32.mrf.mxu0 }
 0x1a1   :  { %v455_v39 = vadd.bf16 %v453_v34, %v425_v36  ;;  %v456_v42 = vmax.bf16 %v777_v1, %v454_v37 }
 0x1a2   :  { %v422_v40 = vpop.f32.mrf.mxu0 }
 0x1a3   :  { %v457_v41 = vmax.bf16 %v777_v1, %v455_v39 }
 0x1a5   :  { %620 = vmatprep.mubr.bf16.mxu1 %v457_v41 }
 0x1a6   :  { %621 = vmatmul.mubr.bf16.vlgmr.msra.gmra.mxu1 %v456_v42 }
 0x266   :  { %v703_v43 = vpop.f32.mrf.mxu1 }
 0x268   :  { %v704_v45 = vpop.f32.mrf.mxu1 }
 0x269   :  { %v705_v46 = vadd.f32 %v704_v45, %v703_v43 }
 0x26a   :  { %v706_v47 = vpop.f32.mrf.mxu1 }
 0x26b   :  { %v623_v48 = vadd.f32 %v705_v46, %v491_v44 }
 0x26c   :  { %v707_v49 = vpop.f32.mrf.mxu1 }
 0x26d   :  { %628 = vst [vmem:[%s1014_s9] sm:$0xff] %v623_v48 }

</bundles_post_ra>
